<compile_context>
chip_gen: v7x
topology: tpu7x:2x2x1
jax: 0.10.0
libtpu: 0.0.40
codegen_flags: <defaults>
</compile_context>

<pallas_src>
import functools

import jax
import jax.numpy as jnp
from jax import lax
from jax.experimental import pallas as pl
from jax.experimental.pallas import tpu as pltpu


def _round_up(x, m):
    return ((x + m - 1) // m) * m


def _word_memory_kernel(u_ref, docs_ref, acc_ref, m_ref, l_ref, *,
                        n_real, n_padded, tile_n, n_tiles_per_split):
    """u_ref: [B, D] bf16 (resident); docs_ref: [tile_n, D] bf16 (streamed);
    acc_ref/m_ref/l_ref: per-split f32 partials used as resident accumulators."""
    s = pl.program_id(0)          # N-split (parallel across TensorCores on v7x)
    n = pl.program_id(1)          # doc tile within the split (softmax reduction)

    @pl.when(n == 0)
    def _init():
        m_ref[...] = jnp.full_like(m_ref, -jnp.inf)
        l_ref[...] = jnp.zeros_like(l_ref)
        acc_ref[...] = jnp.zeros_like(acc_ref)

    docs_bf = docs_ref[...]                                   # [tile_n, D] bf16 (no in-kernel cast)
    u_bf = u_ref[...]                                         # [B, D]      bf16

    # scores = u @ docs_tile.T : contract both last dims, no transpose materialized.
    scores = lax.dot_general(u_bf, docs_bf, (((1,), (1,)), ((), ())),
                             preferred_element_type=jnp.float32)   # [B, tile_n] f32

    if n_padded != n_real:                                    # static Python branch
        col = ((s * n_tiles_per_split + n) * tile_n
               + lax.broadcasted_iota(jnp.int32, scores.shape, 1))
        scores = jnp.where(col < n_real, scores, -1e30)       # f32 mask value

    # Online (flash-style) softmax accumulation over this split's doc tiles.
    m_prev = m_ref[...]                                       # [B, 1]
    m_new = jnp.maximum(m_prev, jnp.max(scores, axis=-1, keepdims=True))
    alpha = jnp.exp(m_prev - m_new)                           # [B, 1]
    p = jnp.exp(scores - m_new)                               # [B, tile_n] f32
    l_ref[...] = alpha * l_ref[...] + jnp.sum(p, axis=-1, keepdims=True)
    acc_ref[...] = alpha * acc_ref[...] + jnp.dot(
        p.astype(jnp.bfloat16), docs_bf, preferred_element_type=jnp.float32)
    m_ref[...] = m_new


def word_memory_attend(u, all_docs, *, tile_n=1024, num_splits=2):
    """Fused softmax(u @ all_docs.T) @ all_docs, streaming all_docs in bf16 tiles.
    u: [B, D] f32; all_docs: [N, D]. Returns [B, D] f32."""
    B, D = u.shape
    N, D2 = all_docs.shape
    assert D == D2

    num_splits = max(1, int(num_splits))
    per_split = pl.cdiv(N, num_splits)
    tile_n = max(128, min(tile_n, _round_up(per_split, 128)))   # don't over-pad tiny tables
    n_tiles_per_split = pl.cdiv(per_split, tile_n)
    n_padded = num_splits * n_tiles_per_split * tile_n

    # TODO(synk): in production, cast/pad the doc table to bf16 once and keep it resident
    # (or int8/fp8 with per-row scales for a further 2x bandwidth cut).
    docs = all_docs.astype(jnp.bfloat16)
    if n_padded != N:
        docs = jnp.pad(docs, ((0, n_padded - N), (0, 0)))
    u_bf = u.astype(jnp.bfloat16)

    # Explicit VMEM budget: double-buffered bf16 doc tiles + small resident operands
    # + headroom; capped so it is safe on v7x (64 MiB physical) and v5e/v6e.
    vmem_limit = (2 * tile_n * D * 2              # docs tiles (2 pipeline buffers, bf16)
                  + 2 * B * D * 2                 # u
                  + 2 * (B * D + 2 * B) * 4       # partial outputs (acc, m, l)
                  + (4 << 20))                    # headroom / compiler internals
    vmem_limit = int(min(max(vmem_limit, 8 << 20), 48 << 20))

    kernel = functools.partial(
        _word_memory_kernel,
        n_real=N, n_padded=n_padded, tile_n=tile_n,
        n_tiles_per_split=n_tiles_per_split)

    acc, m, l = pl.pallas_call(
        kernel,
        out_shape=(
            jax.ShapeDtypeStruct((num_splits, B, D), jnp.float32),   # acc (unnormalized)
            jax.ShapeDtypeStruct((num_splits, B, 1), jnp.float32),   # running max m
            jax.ShapeDtypeStruct((num_splits, B, 1), jnp.float32),   # running denom l
        ),
        grid_spec=pltpu.PrefetchScalarGridSpec(
            num_scalar_prefetch=0,
            grid=(num_splits, n_tiles_per_split),
            in_specs=[
                # u: tiny, constant index_map -> DMA'd once, resident in VMEM.
                pl.BlockSpec((B, D), lambda s, n: (0, 0)),
                # docs: [tile_n, D] bf16 tiles streamed (double-buffered) along the grid.
                pl.BlockSpec((tile_n, D),
                             lambda s, n: (s * n_tiles_per_split + n, 0)),
            ],
            out_specs=(
                # Per-split partials, revisited across the reduction axis (accumulators).
                pl.BlockSpec((None, B, D), lambda s, n: (s, 0, 0)),
                pl.BlockSpec((None, B, 1), lambda s, n: (s, 0, 0)),
                pl.BlockSpec((None, B, 1), lambda s, n: (s, 0, 0)),
            ),
        ),
        compiler_params=pltpu.CompilerParams(
            dimension_semantics=("parallel", "arbitrary"),
            vmem_limit_bytes=vmem_limit,
        ),
    )(u_bf, docs)

    # Combine per-split online-softmax partials (tiny: num_splits x B x D).
    m_g = jnp.max(m, axis=0)                      # [B, 1]
    w = jnp.exp(m - m_g)                          # [num_splits, B, 1]
    o = jnp.sum(w * acc, axis=0) / jnp.sum(w * l, axis=0)
    return o.astype(jnp.float32)


def word_memory_module_forward(embedding_b_table, all_docs, word_seq, *,
                               tile_n=1024, num_splits=2):
    """Equivalent of word_memory.forward(word_seq, all_docs) (usetopk=False branch).
    word_seq: [S, B, 1] int32; embedding_b_table: [V, D]; all_docs: [N, D]."""
    # TODO(synk): word_embedding_b is an arbitrary nn.Module (sentence-transformer in the
    # original); modeled here as an embedding-table lookup (XLA gather) in the wrapper.
    emb = embedding_b_table[word_seq[..., 0]]                 # [S, B, D]
    u = jnp.mean(emb.astype(jnp.float32), axis=0)             # [B, D] f32, mean done in XLA
    # NOTE: batching multiple calls so B grows amortizes the docs stream (biggest
    # systemic lever) -- done by the caller, not here.
    return word_memory_attend(u, all_docs, tile_n=tile_n, num_splits=num_splits)


if __name__ == "__main__":
    S, B = 16, 4            # seq_len, batch
    V, D = 64, 128          # vocab size, embedding dim
    N = 500                 # number of docs (not tile-aligned -> exercises mask + split combine)

    key = jax.random.PRNGKey(0)
    k_tab, k_docs, k_seq = jax.random.split(key, 3)

    embedding_b = jax.random.normal(k_tab, (V, D), jnp.float32) * 0.02
    all_docs = jax.random.normal(k_docs, (N, D), jnp.float32) * 0.05
    word_seq = jax.random.randint(k_seq, (S, B, 1), 0, V, dtype=jnp.int32)

    o = word_memory_module_forward(embedding_b, all_docs, word_seq)
    o = jax.block_until_ready(o)
    assert o.shape == (B, D)

    # Plain-JAX reference of the module's forward (usetopk=False branch).
    emb = embedding_b[word_seq[..., 0]]              # [S, B, D]
    u = jnp.mean(emb, axis=0)                        # [B, D]
    p = jax.nn.softmax(u @ all_docs.T, axis=1)       # [B, N]
    o_ref = p @ all_docs                             # [B, D]

    max_err = float(jnp.max(jnp.abs(o - o_ref)))
    assert max_err < 1e-2, f"max abs err too large: {max_err}"
    print("KERNEL_OK")
</pallas_src>

<mosaic_0001>
module attributes {stable_mosaic.version = 11 : i64} {
  func.func @_word_memory_kernel(%arg0: i32, %arg1: i32, %arg2: memref<4x128xbf16, #tpu.memory_space<vmem>>, %arg3: memref<256x128xbf16, #tpu.memory_space<vmem>>, %arg4: memref<1x4x128xf32, #tpu.memory_space<vmem>>, %arg5: memref<1x4x1xf32, #tpu.memory_space<vmem>>, %arg6: memref<1x4x1xf32, #tpu.memory_space<vmem>>) attributes {dimension_semantics = [#tpu.dimension_semantics<parallel>, #tpu.dimension_semantics<arbitrary>], iteration_bounds = array<i64: 2, 1>, scalar_prefetch = 0 : i64, scratch_operands = 0 : i64, tpu.core_type = #tpu.core_type<tc>, window_params = [{pipeline_mode = #tpu.pipeline_mode<synchronous>, transform_indices = @transform_0, window_bounds = array<i64: 4, 128>}, {transform_indices = @transform_1, window_bounds = array<i64: 256, 128>}, {transform_indices = @transform_2, window_bounds = array<i64: 1, 4, 128>}, {transform_indices = @transform_3, window_bounds = array<i64: 1, 4, 1>}, {transform_indices = @transform_4, window_bounds = array<i64: 1, 4, 1>}]} {
    %c0_i32 = arith.constant 0 : i32
    %0 = arith.cmpi eq, %arg1, %c0_i32 : i32
    %1 = arith.extui %0 : i1 to i32
    %c0_i32_0 = arith.constant 0 : i32
    %2 = arith.cmpi ne, %1, %c0_i32_0 : i32
    scf.if %2 {
      %cst_26 = arith.constant 0xFF800000 : f32
      %48 = vector.broadcast %cst_26 : f32 to vector<4x1xf32>
      %c0_27 = arith.constant 0 : index
      %c0_28 = arith.constant 0 : index
      %c0_29 = arith.constant 0 : index
      %49 = vector.load %arg5[%c0_27, %c0_28, %c0_29] : memref<1x4x1xf32, #tpu.memory_space<vmem>>, vector<1x4x1xf32>
      %50 = vector.shape_cast %49 : vector<1x4x1xf32> to vector<4x1xf32>
      %51 = vector.shape_cast %48 : vector<4x1xf32> to vector<1x4x1xf32>
      tpu.vector_store %arg5[%c0_27, %c0_28, %c0_29], %51 {strides = array<i32>} : memref<1x4x1xf32, #tpu.memory_space<vmem>>, vector<1x4x1xf32>,
      %cst_30 = arith.constant 0.000000e+00 : f32
      %52 = vector.broadcast %cst_30 : f32 to vector<4x1xf32>
      %c0_31 = arith.constant 0 : index
      %c0_32 = arith.constant 0 : index
      %c0_33 = arith.constant 0 : index
      %53 = vector.load %arg6[%c0_31, %c0_32, %c0_33] : memref<1x4x1xf32, #tpu.memory_space<vmem>>, vector<1x4x1xf32>
      %54 = vector.shape_cast %53 : vector<1x4x1xf32> to vector<4x1xf32>
      %55 = vector.shape_cast %52 : vector<4x1xf32> to vector<1x4x1xf32>
      tpu.vector_store %arg6[%c0_31, %c0_32, %c0_33], %55 {strides = array<i32>} : memref<1x4x1xf32, #tpu.memory_space<vmem>>, vector<1x4x1xf32>,
      %cst_34 = arith.constant 0.000000e+00 : f32
      %56 = vector.broadcast %cst_34 : f32 to vector<4x128xf32>
      %c0_35 = arith.constant 0 : index
      %c0_36 = arith.constant 0 : index
      %c0_37 = arith.constant 0 : index
      %57 = vector.load %arg4[%c0_35, %c0_36, %c0_37] : memref<1x4x128xf32, #tpu.memory_space<vmem>>, vector<1x4x128xf32>
      %58 = vector.shape_cast %57 : vector<1x4x128xf32> to vector<4x128xf32>
      %59 = vector.shape_cast %56 : vector<4x128xf32> to vector<1x4x128xf32>
      tpu.vector_store %arg4[%c0_35, %c0_36, %c0_37], %59 {strides = array<i32>} : memref<1x4x128xf32, #tpu.memory_space<vmem>>, vector<1x4x128xf32>,
    } else {
    }
    %c0 = arith.constant 0 : index
    %c0_1 = arith.constant 0 : index
    %3 = vector.load %arg3[%c0, %c0_1] : memref<256x128xbf16, #tpu.memory_space<vmem>>, vector<256x128xbf16>
    %c0_2 = arith.constant 0 : index
    %c0_3 = arith.constant 0 : index
    %4 = vector.load %arg2[%c0_2, %c0_3] : memref<4x128xbf16, #tpu.memory_space<vmem>>, vector<4x128xbf16>
    %cst = arith.constant dense<0.000000e+00> : vector<4x256xf32>
    %5 = tpu.matmul %4, %3, %cst {dimension_numbers = #tpu.dot_dimension_numbers<[1], [1], [0], [0], [0, 0, 1, 0], [], []>} : vector<4x128xbf16>, vector<256x128xbf16>, vector<4x256xf32> -> vector<4x256xf32>
    %c1_i32 = arith.constant 1 : i32
    %6 = arith.muli %arg0, %c1_i32 : i32
    %7 = arith.addi %6, %arg1 : i32
    %c256_i32 = arith.constant 256 : i32
    %8 = arith.muli %7, %c256_i32 : i32
    %9 = tpu.iota {dimensions = array<i32: 1>} : vector<4x256xi32>
    %10 = vector.broadcast %8 : i32 to vector<4x256xi32>
    %11 = arith.addi %10, %9 : vector<4x256xi32>
    %c500_i32 = arith.constant 500 : i32
    %12 = vector.broadcast %c500_i32 : i32 to vector<4x256xi32>
    %13 = arith.cmpi slt, %11, %12 : vector<4x256xi32>
    %cst_4 = arith.constant -1.000000e+30 : f32
    %14 = vector.broadcast %cst_4 : f32 to vector<4x256xf32>
    %15 = arith.select %13, %5, %14 : vector<4x256xi1>, vector<4x256xf32>
    %c0_5 = arith.constant 0 : index
    %c0_6 = arith.constant 0 : index
    %c0_7 = arith.constant 0 : index
    %16 = vector.load %arg5[%c0_5, %c0_6, %c0_7] : memref<1x4x1xf32, #tpu.memory_space<vmem>>, vector<1x4x1xf32>
    %17 = vector.shape_cast %16 : vector<1x4x1xf32> to vector<4x1xf32>
    %cst_8 = arith.constant dense<0xFF800000> : vector<4xf32>
    %18 = vector.multi_reduction <maximumf>, %15, %cst_8 [1] : vector<4x256xf32> to vector<4xf32>
    %19 = vector.shape_cast %18 : vector<4xf32> to vector<4x1xf32>
    %20 = arith.maximumf %17, %19 : vector<4x1xf32>
    %21 = arith.subf %17, %20 : vector<4x1xf32>
    %22 = math.exp %21 : vector<4x1xf32>
    %23 = vector.broadcast %20 : vector<4x1xf32> to vector<4x256xf32>
    %24 = arith.subf %15, %23 : vector<4x256xf32>
    %25 = math.exp %24 : vector<4x256xf32>
    %c0_9 = arith.constant 0 : index
    %c0_10 = arith.constant 0 : index
    %c0_11 = arith.constant 0 : index
    %26 = vector.load %arg6[%c0_9, %c0_10, %c0_11] : memref<1x4x1xf32, #tpu.memory_space<vmem>>, vector<1x4x1xf32>
    %27 = vector.shape_cast %26 : vector<1x4x1xf32> to vector<4x1xf32>
    %28 = arith.mulf %22, %27 : vector<4x1xf32>
    %cst_12 = arith.constant dense<0.000000e+00> : vector<4xf32>
    %29 = vector.multi_reduction <add>, %25, %cst_12 [1] : vector<4x256xf32> to vector<4xf32>
    %30 = vector.shape_cast %29 : vector<4xf32> to vector<4x1xf32>
    %31 = arith.addf %28, %30 : vector<4x1xf32>
    %c0_13 = arith.constant 0 : index
    %c0_14 = arith.constant 0 : index
    %c0_15 = arith.constant 0 : index
    %32 = vector.load %arg6[%c0_13, %c0_14, %c0_15] : memref<1x4x1xf32, #tpu.memory_space<vmem>>, vector<1x4x1xf32>
    %33 = vector.shape_cast %32 : vector<1x4x1xf32> to vector<4x1xf32>
    %34 = vector.shape_cast %31 : vector<4x1xf32> to vector<1x4x1xf32>
    tpu.vector_store %arg6[%c0_13, %c0_14, %c0_15], %34 {strides = array<i32>} : memref<1x4x1xf32, #tpu.memory_space<vmem>>, vector<1x4x1xf32>,
    %c0_16 = arith.constant 0 : index
    %c0_17 = arith.constant 0 : index
    %c0_18 = arith.constant 0 : index
    %35 = vector.load %arg4[%c0_16, %c0_17, %c0_18] : memref<1x4x128xf32, #tpu.memory_space<vmem>>, vector<1x4x128xf32>
    %36 = vector.shape_cast %35 : vector<1x4x128xf32> to vector<4x128xf32>
    %37 = vector.broadcast %22 : vector<4x1xf32> to vector<4x128xf32>
    %38 = arith.mulf %37, %36 : vector<4x128xf32>
    %39 = arith.truncf %25 : vector<4x256xf32> to vector<4x256xbf16>
    %cst_19 = arith.constant dense<0.000000e+00> : vector<4x128xf32>
    %40 = tpu.matmul %39, %3, %cst_19 {dimension_numbers = #tpu.dot_dimension_numbers<[1], [0], [0], [1], [0, 0, 1, 1], [], []>} : vector<4x256xbf16>, vector<256x128xbf16>, vector<4x128xf32> -> vector<4x128xf32>
    %41 = arith.addf %38, %40 : vector<4x128xf32>
    %c0_20 = arith.constant 0 : index
    %c0_21 = arith.constant 0 : index
    %c0_22 = arith.constant 0 : index
    %42 = vector.load %arg4[%c0_20, %c0_21, %c0_22] : memref<1x4x128xf32, #tpu.memory_space<vmem>>, vector<1x4x128xf32>
    %43 = vector.shape_cast %42 : vector<1x4x128xf32> to vector<4x128xf32>
    %44 = vector.shape_cast %41 : vector<4x128xf32> to vector<1x4x128xf32>
    tpu.vector_store %arg4[%c0_20, %c0_21, %c0_22], %44 {strides = array<i32>} : memref<1x4x128xf32, #tpu.memory_space<vmem>>, vector<1x4x128xf32>,
    %c0_23 = arith.constant 0 : index
    %c0_24 = arith.constant 0 : index
    %c0_25 = arith.constant 0 : index
    %45 = vector.load %arg5[%c0_23, %c0_24, %c0_25] : memref<1x4x1xf32, #tpu.memory_space<vmem>>, vector<1x4x1xf32>
    %46 = vector.shape_cast %45 : vector<1x4x1xf32> to vector<4x1xf32>
    %47 = vector.shape_cast %20 : vector<4x1xf32> to vector<1x4x1xf32>
    tpu.vector_store %arg5[%c0_23, %c0_24, %c0_25], %47 {strides = array<i32>} : memref<1x4x1xf32, #tpu.memory_space<vmem>>, vector<1x4x1xf32>,
    return
  }
  func.func @transform_0(%arg0: i32, %arg1: i32) -> (i32, i32) {
    %c0_i32 = arith.constant 0 : i32
    %c0_i32_0 = arith.constant 0 : i32
    %c0_i32_1 = arith.constant 0 : i32
    return %c0_i32, %c0_i32_0 : i32, i32
  }
  func.func @transform_1(%arg0: i32, %arg1: i32) -> (i32, i32) {
    %c1_i32 = arith.constant 1 : i32
    %0 = arith.muli %arg0, %c1_i32 : i32
    %1 = arith.addi %0, %arg1 : i32
    %c0_i32 = arith.constant 0 : i32
    %c0_i32_0 = arith.constant 0 : i32
    return %1, %c0_i32 : i32, i32
  }
  func.func @transform_2(%arg0: i32, %arg1: i32) -> (i32, i32, i32) {
    %c0_i32 = arith.constant 0 : i32
    %c0_i32_0 = arith.constant 0 : i32
    %c0_i32_1 = arith.constant 0 : i32
    return %arg0, %c0_i32, %c0_i32_0 : i32, i32, i32
  }
  func.func @transform_3(%arg0: i32, %arg1: i32) -> (i32, i32, i32) {
    %c0_i32 = arith.constant 0 : i32
    %c0_i32_0 = arith.constant 0 : i32
    %c0_i32_1 = arith.constant 0 : i32
    return %arg0, %c0_i32, %c0_i32_0 : i32, i32, i32
  }
  func.func @transform_4(%arg0: i32, %arg1: i32) -> (i32, i32, i32) {
    %c0_i32 = arith.constant 0 : i32
    %c0_i32_0 = arith.constant 0 : i32
    %c0_i32_1 = arith.constant 0 : i32
    return %arg0, %c0_i32, %c0_i32_0 : i32, i32, i32
  }
}

</mosaic_0001>

<bundles_post_ra>
// kernel: tpu_custom_call.1
= control target key start
LH: loop header
LB: loop body
LE: loop exit
PB: predicated region body
PF: predicated region fallthrough
CT: control target
= control target key end

     0   :  { %10 = vsyncpa [#allocation3], 0  ;;  %s1334_s0 = inlined_call_operand.hbm [shape: bf16[4,128], index: 0, kind: input, shape index: {}]   ;;  %s1335_s1 = inlined_call_operand.hbm [shape: bf16[512,128], index: 1, kind: input, shape index: {}]   ;;  %s1336_s2 = inlined_call_operand.hbm [shape: f32[2,4,128], index: 2, kind: output, shape index: {0}]   ;;  %s1337_s3 = inlined_call_operand.vmem [shape: f32[2,4,1], index: 3, kind: output, shape index: {1}]   ;;  %s1338_s4 = inlined_call_operand.vmem [shape: f32[2,4,1], index: 4, kind: output, shape index: {2}]  }
   0x1   :  { %11 = vsyncpa [#allocation6], 0 }
   0x2   :  { %13 = vsyncpa [#allocation6 + $0x1], 0 }
   0x3   :  { %14 = vsyncpa [#allocation4], 0 }
   0x4   :  { %16 = vsyncpa [#allocation4 + $0x1], 0  ;;  %s1066_s15 = smov 0   ;;  %s1068_s16 = smov 0  }
   0x5   :  { %s1070_s17 = smov 0   ;;  %s1072_s18 = smov 0  }
   0x6   :  { %s1074_s19 = smov 0   ;;  %s1076_s20 = smov 0  }
   0x7 LB: > { %s709_s21 = sadd.s32 4294967295, %s1031_s20   ;;  %s710_s22 = sadd.s32 4294967294, %s1031_s20   ;;  %s1031_s20 = sphi %s1076_s20, %s22_s20   ;;  %s1027_s19 = sphi %s1074_s19, %s1366_s19   ;;  %s1023_s18 = sphi %s1072_s18, %s1365_s18   ;;  %s1019_s17 = sphi %s1070_s17, %s1364_s17   ;;  %s1015_s16 = sphi %s1068_s16, %s1363_s16   ;;  %s1011_s15 = sphi %s1066_s15, %s1362_s15  }
   0x8   : > { %s64_s23 = sadd.s32 1, %s1019_s17  ;;  %p71_p0 = scmp.ne.s32.totalorder %s1019_s17, %s1015_s16 }
   0x9   : > { %p72_p1 = scmp.eq.s32.totalorder %s1031_s20, 0  ;;  %p77_p2 = scmp.ne.s32.totalorder %s1015_s16, %s1011_s15 }
   0xa   : > { %p1104_p3 = scmp.eq.s32.totalorder %s709_s21, 0  ;;  %p101_p4 = scmp.eq.s32.totalorder %s709_s21, 1 }
   0xb   : > { %p1108_p5 = por %p72_p1, %p71_p0  ;;  %p107_p6 = scmp.eq.s32.totalorder %s710_s22, 1 }
   0xc   : > { %s1345_s24 = scalar_select %p1104_p3, 1, 0 }
   0xd   : > { %p1114_p7 = por %p1104_p3, %p77_p2  ;;  %p1118_p8 = por %p101_p4, %p71_p0 }
   0xe   : > { %p1122_p9 = por %p107_p6, %p77_p2  ;;  %p711_p10 = scmp.ge.s32.totalorder %s1031_s20, 1 }
   0xf   : > { %s1347_s26 = scalar_select %p1114_p7, 1, 0 }
  0x10   : > { %s1348_s27 = scalar_select %p1118_p8, 1, 0 }
  0x11   : > { %s1349_s28 = scalar_select %p1122_p9, 1, 0 }
  0x12   : > { %p166_p11 = scmp.lt.s32.totalorder %s1031_s20, 3  ;;  %s1033_s30 = smov [#allocation2]  }
  0x13   : > { %s179_s5 = sshll.u32 %s1033_s30, 4  ;;  %p806_p1 = scmp.lt.s32.totalorder %s1031_s20, 2  ;;  %s180_s5 = int_to_ptr.vmem [resolvable:$true] %s179_s5 }
  0x14   : > { %p1129_p13 = pnand %p711_p10, %p166_p11  ;;  %s34_s8 = sadd.s32 1, %s1027_s19 }
  0x15   : > { %p1138_p4 = pnand %p806_p1, %p1108_p5  ;;  %p1149_p6 = scmp.ge.s32.totalorder %s34_s8, 2 }
  0x16   : > { %s1350_s29 = scalar_select %p1129_p13, 1, 0 }
  0x17   : > { %p793_p0 = pneg %p1129_p13  ;;  %s190_s10 = sand.u32 1, %s1019_s17  }
  0x18   : > { %s1351_s6 = scalar_select %p1138_p4, 1, 0 }
  0x19   : > { %p1144_p2 = pnand %p793_p0, %p1104_p3  ;;  %s887_s13 = scalar_lea.hbm %s1334_s0, 32 }
  0x1a   : > { %s1353_s9 = scalar_select %p1149_p6, 1, 0 }
  0x1b   : > { %p888_p5 = scmp.ne.s32.totalorder %s1334_s0, %s887_s13  ;;  %p889_p10 = pneg %p1144_p2 }
  0x1c   : > { %p894_p0 = scmp.lt.u32.totalorder %s887_s13, %s1334_s0 }
  0x1d   : > { %p890_p11 = pnand %p889_p10, %p888_p5 }
  0x1f   : > { %p891_p1 = pneg %p890_p11 }
  0x21   : > { %p896_p12 = pnand %p894_p0, %p891_p1 }
  0x23   : > { %899 = shalt.err (!%p896_p12)
}
  0x24   : > { %s900_s30 = scalar_lea.vmem %s180_s5, 32  ;;  %p908_p3 = scmp.lt.s32.totalorder %s180_s5, %s180_s5 }
  0x25   : > { %p901_p9 = scmp.ne.s32.totalorder %s180_s5, %s900_s30  ;;  %p909_p13 = scmp.lt.s32.totalorder %s900_s30, %s900_s30 }
  0x27   : > { %p903_p8 = pnand %p901_p9, %p889_p10  ;;  %p910_p4 = por %p909_p13, %p908_p3 }
  0x29   : > { %p904_p7 = pneg %p903_p8 }
  0x2b   : > { %p911_p6 = pnand %p910_p4, %p904_p7 }
  0x2d   : > { %914 = shalt.err (!%p911_p6)
}
  0x2e   : > { %796 = dma.hbm_to_vmem [thread:$0]  (!%p1144_p2), %s1334_s0, 32, %s180_s5, [#allocation3]  }
  0x2f   : > { %p1354_p9 = scmp.ne.s32.totalorder %s1353_s9, 0  ;;  %s714_s13 = sshll.u32 %s190_s10, 7 }
  0x30   : > { %s744_s21 = sshll.u32 %s1027_s19, 11  ;;  %s194_s30 = scalar_lea.vmem [#allocation5], %s714_s13 }
  0x31   : > { %s1368_s8 = smov (%p1354_p9, %s34_s8), 0  ;;  %s1180_s25 = scalar_lea.hbm %s1335_s1, %s744_s21 }
  0x32   : > { %s61_s14 = ssub.s32 %s1027_s19, %s1368_s8  ;;  %s202_s11 = sshll.u32 %s194_s30, 4  ;;  %s1187_s11 = int_to_ptr.vmem [resolvable:$true] %s202_s11 }
  0x33   : > { %p62_p3 = scmp.eq.s32.totalorder %s61_s14, 0  ;;  %s1189_s9 = scalar_lea.sflag [#allocation6], %s190_s10 }
  0x34   : > { %s915_s12 = scalar_lea.hbm %s1180_s25, 2048  ;;  %p1355_p8 = scmp.ne.s32.totalorder %s1351_s6, 0 }
  0x35   : > { %s1185_s5 = scalar_select %p62_p3, %s1019_s17, %s64_s23  }
  0x36   : > { %p916_p7 = scmp.ne.s32.totalorder %s1180_s25, %s915_s12  ;;  %p917_p12 = pneg %p1355_p8 }
  0x37   : > { %s920_s13 = scalar_lea.hbm %s1335_s1, 4096  ;;  %p921_p2 = scmp.lt.u32.totalorder %s1180_s25, %s1335_s1 }
  0x38   : > { %p918_p13 = pnand %p917_p12, %p916_p7  ;;  %p922_p6 = scmp.lt.u32.totalorder %s920_s13, %s915_s12 }
  0x39   : > { %p924_p10 = scmp.lt.u32.totalorder %s915_s12, %s1180_s25 }
  0x3a   : > { %p919_p4 = pneg %p918_p13  ;;  %p923_p5 = por %p922_p6, %p921_p2 }
  0x3c   : > { %p925_p11 = por %p924_p10, %p923_p5 }
  0x3e   : > { %p926_p1 = pnand %p925_p11, %p919_p4 }
  0x40   : > { %929 = shalt.err (!%p926_p1)
}
  0x41   : > { %s930_s23 = scalar_lea.vmem %s1187_s11, 2048  ;;  %s1034_s10 = smov [#allocation5]  }
  0x42   : > { %p931_p0 = scmp.ne.s32.totalorder %s1187_s11, %s930_s23  ;;  %s935_s30 = sshll.u32 %s1034_s10, 4  ;;  %s936_s30 = int_to_ptr.vmem [resolvable:$false] %s935_s30 }
  0x43   : > { %s937_s14 = scalar_lea.vmem %s936_s30, 4096  ;;  %p938_p7 = scmp.lt.s32.totalorder %s1187_s11, %s936_s30 }
  0x44   : > { %p933_p9 = pnand %p931_p0, %p917_p12  ;;  %p939_p13 = scmp.lt.s32.totalorder %s937_s14, %s930_s23 }
  0x46   : > { %p934_p3 = pneg %p933_p9  ;;  %p940_p2 = por %p939_p13, %p938_p7 }
  0x48   : > { %p941_p6 = pnand %p940_p2, %p934_p3 }
  0x4a   : > { %944 = shalt.err (!%p941_p6)
}
  0x4b   : > { %s1035_s12 = smov 64   ;;  %s1036_s21 = smov 4  }
  0x4c   : > { %800 = dma.hbm_to_vmem [thread:$0]  (!%p1355_p8), %s1180_s25, 2048, %s1187_s11, %s1189_s9, %s1035_s12, %s1035_s12, %s1036_s21  }
  0x4d   : > { %p1356_p12 = scmp.ne.s32.totalorder %s1350_s29, 0 }
  0x4e   : > { %p1357_p4 = scmp.ne.s32.totalorder (!%p1356_p12), %s1345_s24, 0 }
  0x4f   : > { %214 = sbr.rel (%p1356_p12) target bundleno = 895 (0x37f), region = 28 }
  0x56   : > { %998 = dma.done.wait (%p1357_p4), [#allocation3], 32  }
  0x57   : > { %1000 = vsyncadd (%p1357_p4), [#allocation3], 4294967264  ;;  %s1224_s13 = sand.u32 1, %s1015_s16   ;;  %p1358_p8 = scmp.ne.s32.totalorder %s1347_s26, 0 }
  0x58   : > { %s719_s7 = sshll.u32 %s1224_s13, 7  ;;  %s221_s22 = scalar_lea.sflag [#allocation6], %s1224_s13 }
  0x59   : > { %s1228_s23 = scalar_lea.vmem [#allocation5], %s719_s7 }
  0x5a   : > { %1002 = dma.done.wait (%p1358_p8), %s221_s22, 2048  }
  0x5b   : > { %1004 = vsyncadd (%p1358_p8), %s221_s22, 4294965248  ;;  %v865_v0 = vld [vmem:[%s1228_s23 + $0x40] sm:$0xff]   ;;  %v867_v2 = vld [vmem:[%s1228_s23 + $0x48] sm:$0xff]   ;;  %p259_p5 = scmp.lt.s32.totalorder %s1023_s18, 1  ;;  %vm272_vm0 = vcmask 3072   ;;  %v1037_v17 = vmov -inf   ;;  %v448_v18 = vlaneseq }
  0x5c   : > { %v866_v1 = vld [vmem:[%s1228_s23] sm:$0xff]   ;;  %745 = vmatprep.subr.bf16.mxu0 %v865_v0  ;;  %763 = vmatprep.subr.bf16.mxu1 %v865_v0  ;;  %v868_v3 = vld [vmem:[%s1228_s23 + $0x8] sm:$0xff]   ;;  %v869_v4 = vld [vmem:[%s1228_s23 + $0x50] sm:$0xff]   ;;  %s739_s11 = sshll.u32 %s1023_s18, 8  ;;  %vm459_vm3 = vcmask 1043456   ;;  %v1038_v33 = vmov 0  }
  0x5d   : > { %746 = vmatpush3.bf16.xpose.msra.mxu0 %v866_v1  ;;  %764 = vmatpush3.bf16.msra.mxu1 %v866_v1  ;;  %v870_v5 = vld [vmem:[%s1228_s23 + $0x10] sm:$0xff]   ;;  %v871_v6 = vld [vmem:[%s1228_s23 + $0x58] sm:$0xff]   ;;  %v873_v8 = vld [vmem:[%s1228_s23 + $0x60] sm:$0xff]   ;;  %s1252_s24 = scalar_select %p259_p5, %s1023_s18, 1  ;;  %v449_v19 = vand.u32 127, %v448_v18  ;;  %v451_v20 = vstv %s739_s11  ;;  %v1039_v34 = vmov 0.0  }
  0x5e   : > { %747 = vmatprep.subr.bf16.mxu0 %v867_v2  ;;  %765 = vmatprep.subr.bf16.mxu1 %v867_v2  ;;  %v872_v7 = vld [vmem:[%s1228_s23 + $0x18] sm:$0xff]   ;;  %v874_v10 = vld [vmem:[%s1228_s23 + $0x20] sm:$0xff]   ;;  %v875_v11 = vld [vmem:[%s1228_s23 + $0x68] sm:$0xff]   ;;  %s720_s14 = sshll.u32 %s1224_s13, 2  ;;  %s741_s21 = sshll.u32 %s1023_s18, 6 }
  0x5f   : > { %v308_v9 = vld [vmem:[#allocation2] sm:$0x3]  ;;  %v876_v12 = vld [vmem:[%s1228_s23 + $0x28] sm:$0xff]   ;;  %v877_v13 = vld [vmem:[%s1228_s23 + $0x70] sm:$0xff]   ;;  %s721_s26 = sshll.u32 %s1252_s24, 2  ;;  %v450_v21 = vadd.s32 128, %v449_v19  ;;  %v452_v22 = vadd.s32 %v451_v20, %v449_v19  ;;  %863 = vset.pattern.permute.xlu0 %v1038_v33  ;;  %864 = vset.pattern.permute.xlu1 %v1038_v33  ;;  %s1285_s24 = scalar_lea.hbm %s1336_s2, %s741_s21 }
  0x60   : > { %761 = vmatprep.mubr.bf16.mxu0 %v308_v9  ;;  %v878_v14 = vld [vmem:[%s1228_s23 + $0x30] sm:$0xff]   ;;  %v879_v15 = vld [vmem:[%s1228_s23 + $0x78] sm:$0xff]   ;;  %s1258_s25 = scalar_lea.vmem %s1337_s3, %s721_s26  ;;  %s1268_s30 = scalar_lea.vmem %s1338_s4, %s721_s26 }
  0x61   : > { %766 = vmatpush3.bf16.msra.mxu1 %v868_v3  ;;  %v880_v16 = vld [vmem:[%s1228_s23 + $0x38] sm:$0xff]   ;;  %273 = vst.msk [vmem:[%s1258_s25] sm:$0xf] %vm272_vm0, %v1037_v17  ;;  %v453_v23 = vadd.s32 %v451_v20, %v450_v21  ;;  %vm454_vm1 = vcmp.lt.s32.totalorder %v452_v22, 500  ;;  %274 = vst.msk [vmem:[%s1268_s30] sm:$0xf] %vm272_vm0, %v1039_v34 }
  0x62   : > { %767 = vmatprep.subr.bf16.mxu1 %v869_v4  ;;  %s244_s12 = scalar_lea.vmem [#allocation7], %s720_s14  ;;  %s543_s26 = scalar_lea.sflag [#allocation4], %s1224_s13 }
  0x63   : > { %vm455_vm2 = vcmp.lt.s32.totalorder %v453_v23, 500  ;;  %275 = vst [vmem:[%s244_s12] sm:$0xf] %v1039_v34  ;;  %s564_s7 = sshll.u32 %s244_s12, 4  ;;  %p1359_p11 = scmp.ne.s32.totalorder %s1348_s27, 0  ;;  %s1287_s7 = int_to_ptr.vmem [resolvable:$true] %s564_s7 }
  0x64   : > { %s945_s29 = scalar_lea.vmem %s1287_s7, 64  ;;  %s1040_s18 = smov [#allocation7]  }
  0x65   : > { %748 = vmatpush3.bf16.xpose.msra.mxu0 %v868_v3  ;;  %768 = vmatpush3.bf16.msra.mxu1 %v870_v5  ;;  %p946_p10 = scmp.ne.s32.totalorder %s1287_s7, %s945_s29  ;;  %s949_s6 = sshll.u32 %s1040_s18, 4  ;;  %s950_s6 = int_to_ptr.vmem [resolvable:$false] %s949_s6 }
  0x66   : > { %749 = vmatprep.subr.bf16.mxu0 %v869_v4  ;;  %769 = vmatprep.subr.bf16.mxu1 %v871_v6  ;;  %p952_p9 = scmp.lt.s32.totalorder %s1287_s7, %s950_s6 }
  0x67   : > { %p947_p1 = pnand %p946_p10, %p1359_p11 }
  0x68   : > { %v458_v35 = vld [vmem:[%s1258_s25] sm:$0xf] }
  0x69   : > { %770 = vmatpush3.bf16.msra.mxu1 %v872_v7  ;;  %v480_v53 = vld [vmem:[%s1268_s30] sm:$0xf]  ;;  %p948_p0 = pneg %p947_p1 }
  0x6a   : > { %771 = vmatprep.subr.bf16.mxu1 %v873_v8  ;;  %v490_v57 = vld [vmem:[%s244_s12] sm:$0xf] }
  0x6d   : > { %750 = vmatpush3.bf16.xpose.msra.mxu0 %v870_v5  ;;  %772 = vmatpush3.bf16.msra.mxu1 %v874_v10 }
  0x6e   : > { %751 = vmatprep.subr.bf16.mxu0 %v871_v6  ;;  %773 = vmatprep.subr.bf16.mxu1 %v875_v11 }
  0x71   : > { %774 = vmatpush3.bf16.msra.mxu1 %v876_v12 }
  0x72   : > { %775 = vmatprep.subr.bf16.mxu1 %v877_v13 }
  0x75   : > { %752 = vmatpush3.bf16.xpose.msra.mxu0 %v872_v7  ;;  %776 = vmatpush3.bf16.msra.mxu1 %v878_v14 }
  0x76   : > { %753 = vmatprep.subr.bf16.mxu0 %v873_v8  ;;  %777 = vmatprep.subr.bf16.mxu1 %v879_v15 }
  0x79   : > { %778 = vmatpush3.bf16.msra.mxu1 %v880_v16 }
  0x7d   : > { %754 = vmatpush3.bf16.xpose.msra.mxu0 %v874_v10 }
  0x7e   : > { %755 = vmatprep.subr.bf16.mxu0 %v875_v11 }
  0x85   : > { %756 = vmatpush3.bf16.xpose.msra.mxu0 %v876_v12 }
  0x86   : > { %757 = vmatprep.subr.bf16.mxu0 %v877_v13 }
  0x8d   : > { %758 = vmatpush3.bf16.xpose.msra.mxu0 %v878_v14 }
  0x8e   : > { %759 = vmatprep.subr.bf16.mxu0 %v879_v15 }
  0x95   : > { %760 = vmatpush3.bf16.xpose.msra.mxu0 %v880_v16 }
  0x9c   : > { %762 = vmatmul.mubr.bf16.vlgmr.msra.gmra.mrb[0].mxu0 %v308_v9 }
 0x16f   : > { %v439_v24 = vpop.f32.mrb[0].mxu0 }
 0x170   : > { %v456_v25 = vsel %vm454_vm1, %v439_v24, -1e+30  ;;  %v441_v26 = vpop.f32.mrb[1].mxu0 }
 0x171   : > { %v457_v27 = vsel %vm455_vm2, %v441_v26, -1e+30  ;;  %v443_v28 = vpop.f32.mrb[2].mxu0  ;;  %v460_v29 = vsel %vm459_vm3, %v456_v25, -inf }
 0x172   : > { %v444_v30 = vpop.f32.mrb[3].mxu0  ;;  %v461_v31 = vsel %vm459_vm3, %v457_v27, -inf }
 0x173   : > { %v462_v32 = vmax.f32 %v460_v29, %v461_v31 }
 0x175   : > { %463 = vmax.xlane.f32.xlu0 %v462_v32 }
 0x202   : > { %v464_v36 = vpop.xlane.xlu0 %463 }
 0x203   : > { %v465_v37 = vmax.f32 %v458_v35, %v464_v36 }
 0x205   : > { %v466_v38 = vsub.f32 %v458_v35, %v465_v37  ;;  %541 = vst.msk [vmem:[%s1258_s25] sm:$0xf] %vm272_vm0, %v465_v37  ;;  %471 = vperm.xlu0 %863, %v465_v37   ;;  %s951_s25 = scalar_lea.vmem %s950_s6, 128 }
 0x206   : > { %p953_p3 = scmp.lt.s32.totalorder %s951_s25, %s945_s29 }
 0x207   : > { %v467_v51 = vmul.f32 1.442695, %v466_v38 }
 0x208   : > { %p954_p7 = por %p953_p3, %p952_p9 }
 0x20a   : > { %p955_p13 = pnand %p954_p7, %p948_p0 }
 0x284   : > { %v472_v39 = vpop.permute.xlu0 %471 }
 0x285   : > { %v474_v40 = vsub.f32 %v456_v25, %v472_v39  ;;  %v475_v41 = vsub.f32 %v457_v27, %v472_v39 }
 0x287   : > { %v476_v42 = vmul.f32 1.442695, %v474_v40  ;;  %v478_v43 = vmul.f32 1.442695, %v475_v41 }
 0x289   : > { %881 = vpow2.f32 %v476_v42 }
 0x28a   : > { %883 = vpow2.f32 %v478_v43 }
 0x28b   : > { %885 = vpow2.f32 %v467_v51 }
 0x293   : > { %v882_v44 = vpop.eup %881 }
 0x294   : > { %v884_v45 = vpop.eup %883  ;;  %v497_v46 = vpack.c.bf16 %v882_v44, %v882_v44  ;;  %v482_v47 = vsel %vm459_vm3, %v882_v44, 0.0 }
 0x295   : > { %v498_v48 = vpack.c.bf16 %v884_v45, %v884_v45  ;;  %v483_v49 = vsel %vm459_vm3, %v884_v45, 0.0  ;;  %v886_v52 = vpop.eup %885 }
 0x296   : > { %v484_v50 = vadd.f32 %v483_v49, %v482_v47  ;;  %v481_v54 = vmul.f32 %v886_v52, %v480_v53 }
 0x297   : > { %531 = vmatprep.mubr.bf16.mxu1 %v498_v48 }
 0x298   : > { %532 = vmatmul.mubr.bf16.vlgmr.msra.gmra.mrb[0].mxu1 %v497_v46  ;;  %485 = vadd.xlane.f32.xlu1 %v484_v50 }
 0x2a9   : > { %493 = vperm.xlu1 %864, %v886_v52  }
 0x325   : > { %v486_v55 = vpop.xlane.xlu1 %485 }
 0x326   : > { %v487_v56 = vadd.f32 %v486_v55, %v481_v54 }
 0x328   : > { %489 = vst.msk [vmem:[%s1268_s30] sm:$0xf] %vm272_vm0, %v487_v56 }
 0x329   : > { %v494_v58 = vpop.permute.xlu1 %493 }
 0x32a   : > { %v496_v61 = vmul.f32 %v494_v58, %v490_v57 }
 0x36b   : > { %v779_v59 = vpop.f32.mrb[0].mxu1 }
 0x36c   : > { %v780_v60 = vpop.f32.mrb[1].mxu1 }
 0x36d   : > { %v781_v62 = vadd.f32 %v780_v60, %v779_v59  ;;  %v782_v63 = vpop.f32.mrb[2].mxu1 }
 0x36e   : > { %v783_v0 = vpop.f32.mrb[3].mxu1 }
 0x36f   : > { %v539_v1 = vadd.f32 %v781_v62, %v496_v61 }
 0x371   : > { %540 = vst [vmem:[%s244_s12] sm:$0xf] %v539_v1 }
 0x372   : > { %958 = shalt.err (!%p955_p13)
}
 0x373   : > { %s959_s13 = scalar_lea.hbm %s1285_s24, 64  ;;  %s963_s10 = scalar_lea.hbm %s1336_s2, 128 }
 0x374   : > { %p960_p2 = scmp.ne.s32.totalorder %s1285_s24, %s959_s13  ;;  %p964_p4 = scmp.lt.u32.totalorder %s1285_s24, %s1336_s2 }
 0x375   : > { %p965_p8 = scmp.lt.u32.totalorder %s963_s10, %s959_s13  ;;  %p967_p10 = scmp.lt.u32.totalorder %s959_s13, %s1285_s24 }
 0x376   : > { %p961_p6 = pnand %p960_p2, %p1359_p11 }
 0x377   : > { %p966_p5 = por %p965_p8, %p964_p4 }
 0x378   : > { %p962_p12 = pneg %p961_p6 }
 0x379   : > { %p968_p1 = por %p967_p10, %p966_p5 }
 0x37b   : > { %p969_p0 = pnand %p968_p1, %p962_p12 }
 0x37d   : > { %972 = shalt.err (!%p969_p0)
}
 0x37e   : > { %791 = dma.vmem_to_hbm [thread:$0]  (%p1359_p11), %s1287_s7, 64, %s1285_s24, %s543_s26  }
 0x37f PF: > { %s582_s12 = sand.u32 1, %s1011_s15   ;;  %p1360_p9 = scmp.ne.s32.totalorder %s1349_s28, 0 }
 0x380   : > { %p1361_p3 = scmp.ge.s32.totalorder %s1031_s20, 2  ;;  %s583_s21 = scalar_lea.sflag [#allocation4], %s582_s12 }
 0x382   : > { %p802_p7 = pnand %p1361_p3, %p1360_p9 }
 0x384   : > { %1006 = dma.done.wait (!%p802_p7), %s583_s21, 64  }
 0x385   : > { %1008 = vsyncadd (!%p802_p7), %s583_s21, 4294967232  ;;  %s22_s20 = sadd.s32 1, %s1031_s20   ;;  %s1362_s15 = smov %s1015_s16 }
 0x386   : > { %p19_p13 = scmp.ge.s32.totalorder %s22_s20, 4   ;;  %s1363_s16 = smov %s1019_s17 }
 0x387   : > { %s1364_s17 = smov %s1185_s5  ;;  %s1365_s18 = smov %s1027_s19 }
 0x388   : > { %s1366_s19 = smov %s1368_s8  ;;  %21 = sbr.rel (!%p19_p13) target bundleno = 7 (0x7), region = 106 }
 0x38f   :  { %602 = vsyncpa [#allocation3], 1 }
 0x390   :  { %604 = vsyncpa [#allocation3 + $0x1], 1 }
 0x391   :  { %605 = vsyncpa [#allocation6], 1 }
 0x392   :  { %607 = vsyncpa [#allocation6 + $0x1], 1 }
 0x393   :  { %608 = vsyncpa [#allocation4], 1 }
 0x394   :  { %610 = vsyncpa [#allocation4 + $0x1], 1 }

</bundles_post_ra>
